<compile_context>
chip_gen: v7x
topology: tpu7x:2x2x1
jax: 0.10.0
libtpu: 0.0.40
codegen_flags: <defaults>
</compile_context>

<pallas_src>
import jax
import jax.numpy as jnp
import numpy as np
from jax.experimental import pallas as pl
from jax.experimental.pallas import tpu as pltpu


def _round_up(x, m):
    return ((x + m - 1) // m) * m


def _downsample_kernel(pairs_ref, halo_ref, w_eo_ref, w0_ref, b_ref, o_ref):
    # pairs_ref: (TL, 2*C_in)   row t = [ x[2t] | x[2t+1] ]
    # halo_ref:  (8,  2*C_in)   8-row slab whose LAST row is pairs[t0 - 1]
    # w_eo_ref:  (2*C_in, TC)   [ W_tap1 ; W_tap2 ]   (ci, co)
    # w0_ref:    (C_in,  TC)      W_tap0             (ci, co)
    # b_ref:     (1, TC)        float32 bias
    # o_ref:     (TL, TC)
    j = pl.program_id(2)                      # position along the L_out tiling axis
    tl = o_ref.shape[0]
    c_in = w0_ref.shape[0]

    pairs = pairs_ref[...]                    # (TL, 2C)

    # Taps k=1 (even positions) and k=2 (odd positions): a single MXU call on the
    # contiguous, de-interleaved tile.
    acc = jnp.dot(pairs, w_eo_ref[...], preferred_element_type=jnp.float32)

    # Tap k=0 needs x[2t-1] = odd[t-1]: shift the odd half down by one row and
    # splice in the cross-tile halo row (zero for the very first tile == the
    # conv's left zero-padding).
    odd = pairs[:, c_in:]                     # (TL, C)
    halo = halo_ref[7:8, c_in:]               # (1, C)  == pairs[t0 - 1, C:]
    halo = jnp.where(j == 0, jnp.zeros_like(halo), halo)
    odd_prev = jnp.concatenate([halo, odd[: tl - 1, :]], axis=0)   # (TL, C)
    acc = acc + jnp.dot(odd_prev, w0_ref[...], preferred_element_type=jnp.float32)

    o_ref[...] = (acc + b_ref[...]).astype(o_ref.dtype)


def downsample_nlc(x_nlc, weight, bias, *, compute_dtype=None, tl_max=512):
    """Conv1d(C, C, k=3, stride=2, pad=1) on NLC input; returns NLC output.

    x_nlc:  (B, L, C)
    weight: (C_out, C_in, 3)   (PyTorch layout)
    bias:   (C_out,)
    """
    B, L, C = x_nlc.shape
    assert weight.shape == (C, C, 3)
    L_out = (L - 1) // 2 + 1
    out_dtype = x_nlc.dtype
    cdt = out_dtype if compute_dtype is None else compute_dtype

    # ---- tile selection -------------------------------------------------
    TC = C                                    # C_out tile (lane-dense when possible)
    for cand in (512, 256, 128):
        if C > cand and C % cand == 0:
            TC = cand
            break

    TL = min(tl_max, _round_up(L_out, 8))     # L_out tile (sublanes), multiple of 8
    TL = _round_up(TL, 8)
    esize = jnp.dtype(cdt).itemsize

    def _step_vmem(tl):                       # rough double-buffered working set
        pairs_b = tl * 2 * C * esize
        w_b = 3 * C * TC * esize
        out_b = tl * TC * jnp.dtype(out_dtype).itemsize
        return 2 * (pairs_b + w_b + out_b)

    while TL > 8 and _step_vmem(TL) > 20 * 1024 * 1024:   # stay well under scoped VMEM
        TL = max(8, _round_up(TL // 2, 8))

    nLt = pl.cdiv(L_out, TL)
    nCt = C // TC
    R = nLt * TL                              # padded number of output rows

    # ---- layout plumbing (fuses into one copy pass under XLA) -----------
    x_p = x_nlc.astype(cdt)
    if 2 * R != L:
        x_p = jnp.pad(x_p, ((0, 0), (0, 2 * R - L), (0, 0)))
    pairs = x_p.reshape(B, R, 2 * C)          # free reshape: row t = [x[2t] | x[2t+1]]

    w_kic = jnp.transpose(weight, (2, 1, 0)).astype(cdt)      # (3, C_in, C_out)
    w_eo = jnp.concatenate([w_kic[1], w_kic[2]], axis=0)      # (2C, C_out): taps 1,2
    w0 = w_kic[0]                                             # (C,  C_out): tap 0
    b_row = bias.reshape(1, C).astype(jnp.float32)

    grid = (B, nCt, nLt)                      # L_out tiles innermost -> weights stay resident
    out_nlc = pl.pallas_call(
        _downsample_kernel,
        out_shape=jax.ShapeDtypeStruct((B, R, C), out_dtype),
        grid=grid,
        in_specs=[
            # main de-interleaved tile
            pl.BlockSpec((None, TL, 2 * C), lambda b, c, j: (b, j, 0)),
            # 8-row halo whose last row is pairs[j*TL - 1] (clamped for j==0)
            pl.BlockSpec((None, 8, 2 * C),
                         lambda b, c, j: (b, jnp.maximum(j * (TL // 8) - 1, 0), 0)),
            pl.BlockSpec((2 * C, TC), lambda b, c, j: (0, c)),
            pl.BlockSpec((C, TC), lambda b, c, j: (0, c)),
            pl.BlockSpec((1, TC), lambda b, c, j: (0, c)),
        ],
        out_specs=pl.BlockSpec((None, TL, TC), lambda b, c, j: (b, j, c)),
        compiler_params=pltpu.CompilerParams(
            dimension_semantics=("parallel", "parallel", "parallel")),
    )(pairs, pairs, w_eo, w0, b_row)

    if R != L_out:
        out_nlc = out_nlc[:, :L_out, :]
    return out_nlc


def downsample(x_ncl, weight, bias, *, compute_dtype=None, tl_max=512):
    """PyTorch-layout wrapper: x (B, C, L) -> (B, C, L_out)."""
    x_nlc = jnp.transpose(x_ncl, (0, 2, 1))
    out_nlc = downsample_nlc(x_nlc, weight, bias,
                             compute_dtype=compute_dtype, tl_max=tl_max)
    return jnp.transpose(out_nlc, (0, 2, 1))


def _reference(x_ncl, weight, bias):
    out = jax.lax.conv_general_dilated(
        x_ncl, weight, window_strides=(2,), padding=[(1, 1)],
        dimension_numbers=("NCH", "OIH", "NCH"))
    return out + bias[None, :, None]


def _make_params(key, C):
    kw, kb = jax.random.split(key)
    fan_in = C * 3
    bound = 1.0 / float(np.sqrt(fan_in))
    weight = jax.random.uniform(kw, (C, C, 3), minval=-bound, maxval=bound,
                                dtype=jnp.float32)
    bias = jax.random.uniform(kb, (C,), minval=-bound, maxval=bound,
                              dtype=jnp.float32)
    return weight, bias


if __name__ == "__main__":
    key = jax.random.PRNGKey(0)

    # 1) base case (even L, single tile)
    k1, k2, k3, k4 = jax.random.split(key, 4)
    B, C, L = 2, 4, 16
    x = jax.random.normal(k1, (B, C, L), dtype=jnp.float32)
    w, b = _make_params(k2, C)
    out = jax.block_until_ready(downsample(x, w, b))
    ref = _reference(x, w, b)
    assert out.shape == (B, C, (L - 1) // 2 + 1), out.shape
    np.testing.assert_allclose(np.asarray(out), np.asarray(ref), rtol=1e-5, atol=1e-5)

    # 2) odd L, multiple L-tiles (exercises the cross-tile halo and tail padding)
    B2, C2, L2 = 2, 4, 37
    x2 = jax.random.normal(k3, (B2, C2, L2), dtype=jnp.float32)
    w2, b2 = _make_params(k4, C2)
    out2 = jax.block_until_ready(downsample(x2, w2, b2, tl_max=8))
    ref2 = _reference(x2, w2, b2)
    assert out2.shape == (B2, C2, (L2 - 1) // 2 + 1), out2.shape
    np.testing.assert_allclose(np.asarray(out2), np.asarray(ref2), rtol=1e-5, atol=1e-5)

    # 3) channel-tiled path (C_out split across the grid)
    k5, k6 = jax.random.split(k1)
    B3, C3, L3 = 1, 256, 16
    x3 = jax.random.normal(k5, (B3, C3, L3), dtype=jnp.float32)
    w3, b3 = _make_params(k6, C3)
    out3 = jax.block_until_ready(downsample(x3, w3, b3))
    ref3 = _reference(x3, w3, b3)
    np.testing.assert_allclose(np.asarray(out3), np.asarray(ref3), rtol=1e-4, atol=1e-4)

    # 4) bf16 MXU fast path (f32 accumulation) — looser tolerance by construction
    out_bf16 = jax.block_until_ready(downsample(x, w, b, compute_dtype=jnp.bfloat16))
    np.testing.assert_allclose(np.asarray(out_bf16), np.asarray(ref),
                               rtol=3e-2, atol=3e-2)

    print("KERNEL_OK")
</pallas_src>

<mosaic_0001>
module attributes {stable_mosaic.version = 11 : i64} {
  func.func @_downsample_kernel(%arg0: i32, %arg1: i32, %arg2: i32, %arg3: memref<1x8x8xf32, #tpu.memory_space<vmem>>, %arg4: memref<1x8x8xf32, #tpu.memory_space<vmem>>, %arg5: memref<8x4xf32, #tpu.memory_space<vmem>>, %arg6: memref<4x4xf32, #tpu.memory_space<vmem>>, %arg7: memref<1x4xf32, #tpu.memory_space<vmem>>, %arg8: memref<1x8x4xf32, #tpu.memory_space<vmem>>) attributes {dimension_semantics = [#tpu.dimension_semantics<parallel>, #tpu.dimension_semantics<parallel>, #tpu.dimension_semantics<parallel>], iteration_bounds = array<i64: 2, 1, 1>, scalar_prefetch = 0 : i64, scratch_operands = 0 : i64, tpu.core_type = #tpu.core_type<tc>, window_params = [{transform_indices = @transform_0, window_bounds = array<i64: 1, 8, 8>}, {transform_indices = @transform_1, window_bounds = array<i64: 1, 8, 8>}, {transform_indices = @transform_2, window_bounds = array<i64: 8, 4>}, {transform_indices = @transform_3, window_bounds = array<i64: 4, 4>}, {transform_indices = @transform_4, window_bounds = array<i64: 1, 4>}, {transform_indices = @transform_5, window_bounds = array<i64: 1, 8, 4>}]} {
    %c0 = arith.constant 0 : index
    %c0_0 = arith.constant 0 : index
    %c0_1 = arith.constant 0 : index
    %0 = vector.load %arg3[%c0, %c0_0, %c0_1] : memref<1x8x8xf32, #tpu.memory_space<vmem>>, vector<1x8x8xf32>
    %1 = vector.shape_cast %0 : vector<1x8x8xf32> to vector<8x8xf32>
    %c0_2 = arith.constant 0 : index
    %c0_3 = arith.constant 0 : index
    %2 = vector.load %arg5[%c0_2, %c0_3] : memref<8x4xf32, #tpu.memory_space<vmem>>, vector<8x4xf32>
    %cst = arith.constant dense<0.000000e+00> : vector<8x4xf32>
    %3 = tpu.matmul %1, %2, %cst {dimension_numbers = #tpu.dot_dimension_numbers<[1], [0], [0], [1], [0, 0, 1, 1], [], []>} : vector<8x8xf32>, vector<8x4xf32>, vector<8x4xf32> -> vector<8x4xf32>
    %4 = vector.extract_strided_slice %1 {offsets = [0, 4], sizes = [8, 4], strides = [1, 1]} : vector<8x8xf32> to vector<8x4xf32>
    %c0_4 = arith.constant 0 : index
    %c7 = arith.constant 7 : index
    %c4 = arith.constant 4 : index
    %5 = vector.load %arg4[%c0_4, %c7, %c4] : memref<1x8x8xf32, #tpu.memory_space<vmem>>, vector<1x1x4xf32>
    %6 = vector.shape_cast %5 : vector<1x1x4xf32> to vector<1x4xf32>
    %c0_i32 = arith.constant 0 : i32
    %7 = arith.cmpi eq, %arg2, %c0_i32 : i32
    %cst_5 = arith.constant 0.000000e+00 : f32
    %8 = vector.broadcast %cst_5 : f32 to vector<1x4xf32>
    %9 = arith.select %7, %8, %6 : vector<1x4xf32>
    %10 = vector.extract_strided_slice %4 {offsets = [0, 0], sizes = [7, 4], strides = [1, 1]} : vector<8x4xf32> to vector<7x4xf32>
    %11 = tpu.concatenate %9, %10 in 0 : vector<1x4xf32>, vector<7x4xf32> -> vector<8x4xf32>
    %c0_6 = arith.constant 0 : index
    %c0_7 = arith.constant 0 : index
    %12 = vector.load %arg6[%c0_6, %c0_7] : memref<4x4xf32, #tpu.memory_space<vmem>>, vector<4x4xf32>
    %cst_8 = arith.constant dense<0.000000e+00> : vector<8x4xf32>
    %13 = tpu.matmul %11, %12, %cst_8 {dimension_numbers = #tpu.dot_dimension_numbers<[1], [0], [0], [1], [0, 0, 1, 1], [], []>} : vector<8x4xf32>, vector<4x4xf32>, vector<8x4xf32> -> vector<8x4xf32>
    %14 = arith.addf %3, %13 : vector<8x4xf32>
    %c0_9 = arith.constant 0 : index
    %c0_10 = arith.constant 0 : index
    %15 = vector.load %arg7[%c0_9, %c0_10] : memref<1x4xf32, #tpu.memory_space<vmem>>, vector<1x4xf32>
    %16 = vector.broadcast %15 : vector<1x4xf32> to vector<8x4xf32>
    %17 = arith.addf %14, %16 : vector<8x4xf32>
    %c0_11 = arith.constant 0 : index
    %c0_12 = arith.constant 0 : index
    %c0_13 = arith.constant 0 : index
    %18 = vector.load %arg8[%c0_11, %c0_12, %c0_13] : memref<1x8x4xf32, #tpu.memory_space<vmem>>, vector<1x8x4xf32>
    %19 = vector.shape_cast %18 : vector<1x8x4xf32> to vector<8x4xf32>
    %20 = vector.shape_cast %17 : vector<8x4xf32> to vector<1x8x4xf32>
    tpu.vector_store %arg8[%c0_11, %c0_12, %c0_13], %20 {strides = array<i32>} : memref<1x8x4xf32, #tpu.memory_space<vmem>>, vector<1x8x4xf32>,
    return
  }
  func.func @transform_0(%arg0: i32, %arg1: i32, %arg2: i32) -> (i32, i32, i32) {
    %c0_i32 = arith.constant 0 : i32
    %c0_i32_0 = arith.constant 0 : i32
    return %arg0, %arg2, %c0_i32 : i32, i32, i32
  }
  func.func @transform_1(%arg0: i32, %arg1: i32, %arg2: i32) -> (i32, i32, i32) {
    %c1_i32 = arith.constant 1 : i32
    %0 = arith.muli %arg2, %c1_i32 : i32
    %c1_i32_0 = arith.constant 1 : i32
    %1 = arith.subi %0, %c1_i32_0 : i32
    %c0_i32 = arith.constant 0 : i32
    %2 = arith.maxsi %1, %c0_i32 : i32
    %c0_i32_1 = arith.constant 0 : i32
    %c0_i32_2 = arith.constant 0 : i32
    return %arg0, %2, %c0_i32_1 : i32, i32, i32
  }
  func.func @transform_2(%arg0: i32, %arg1: i32, %arg2: i32) -> (i32, i32) {
    %c0_i32 = arith.constant 0 : i32
    %c0_i32_0 = arith.constant 0 : i32
    return %c0_i32, %arg1 : i32, i32
  }
  func.func @transform_3(%arg0: i32, %arg1: i32, %arg2: i32) -> (i32, i32) {
    %c0_i32 = arith.constant 0 : i32
    %c0_i32_0 = arith.constant 0 : i32
    return %c0_i32, %arg1 : i32, i32
  }
  func.func @transform_4(%arg0: i32, %arg1: i32, %arg2: i32) -> (i32, i32) {
    %c0_i32 = arith.constant 0 : i32
    %c0_i32_0 = arith.constant 0 : i32
    return %c0_i32, %arg1 : i32, i32
  }
  func.func @transform_5(%arg0: i32, %arg1: i32, %arg2: i32) -> (i32, i32, i32) {
    %c0_i32 = arith.constant 0 : i32
    return %arg0, %arg2, %arg1 : i32, i32, i32
  }
}

</mosaic_0001>

<bundles_post_ra>
// kernel: tpu_custom_call.1
= control target key start
LH: loop header
LB: loop body
LE: loop exit
PB: predicated region body
PF: predicated region fallthrough
CT: control target
= control target key end

     0   :  { %10 = vsyncpa [#allocation3], 0  ;;  %s1147_s0 = inlined_call_operand.hbm [shape: f32[2,8,8], index: 0, kind: input, shape index: {}]   ;;  %s1148_s1 = inlined_call_operand.hbm [shape: f32[2,8,8], index: 1, kind: input, shape index: {}]   ;;  %s1149_s2 = inlined_call_operand.vmem [shape: f32[8,4], index: 2, kind: input, shape index: {}]   ;;  %s1150_s3 = inlined_call_operand.vmem [shape: f32[4,4], index: 3, kind: input, shape index: {}]   ;;  %s1151_s4 = inlined_call_operand.vmem [shape: f32[1,4], index: 4, kind: input, shape index: {}]   ;;  %s1152_s5 = inlined_call_operand.vmem [shape: f32[2,8,4], index: 5, kind: output, shape index: {}]  }
   0x1   :  { %12 = vsyncpa [#allocation3 + $0x1], 0 }
   0x2   :  { %13 = vsyncpa [#allocation5], 0 }
   0x3   :  { %15 = vsyncpa [#allocation5 + $0x1], 0  ;;  %s966_s18 = smov 0   ;;  %s968_s19 = smov 0  }
   0x4   :  { %s970_s20 = smov 0   ;;  %s972_s21 = smov 0  }
   0x5   :  { %s974_s22 = smov 0   ;;  %s976_s23 = smov 0  }
   0x6 LB: > { %s717_s24 = sadd.s32 4294967295, %s929_s23   ;;  %s40_s25 = sadd.s32 1, %s925_s22  ;;  %s929_s23 = sphi %s976_s23, %s21_s23   ;;  %s925_s22 = sphi %s974_s22, %s1166_s22   ;;  %s921_s21 = sphi %s972_s21, %s1165_s21   ;;  %s917_s20 = sphi %s970_s20, %s1164_s20   ;;  %s913_s19 = sphi %s968_s19, %s1163_s19   ;;  %s909_s18 = sphi %s966_s18, %s1162_s18  }
   0x7   : > { %p42_p0 = scmp.ge.s32.totalorder %s40_s25, 2  ;;  %s49_s26 = sadd.s32 1, %s917_s20 }
   0x8   : > { %p56_p1 = scmp.ne.s32.totalorder %s917_s20, %s913_s19  ;;  %p57_p2 = scmp.eq.s32.totalorder %s929_s23, 0 }
   0x9   : > { %s1168_s25 = smov (%p42_p0, %s40_s25), 0  ;;  %p62_p4 = scmp.ne.s32.totalorder %s913_s19, %s909_s18 }
   0xa   : > { %p1002_p3 = por %p57_p2, %p56_p1  ;;  %s44_s28 = ssub.s32 %s925_s22, %s1168_s25 }
   0xb   : > { %p63_p5 = scmp.eq.s32.totalorder %s717_s24, 0  ;;  %p47_p6 = scmp.eq.s32.totalorder %s44_s28, 0 }
   0xc   : > { %p763_p8 = scmp.lt.s32.totalorder %s929_s23, 2  ;;  %s1018_s6 = sand.u32 1, %s917_s20  }
   0xd   : > { %p1009_p7 = por %p63_p5, %p62_p4  ;;  %s725_s7 = sshll.u32 %s925_s22, 7 }
   0xe   : > { %s1015_s30 = scalar_select %p47_p6, %s917_s20, %s49_s26  }
   0xf   : > { %s1155_s29 = scalar_select %p1009_p7, 1, 0 }
  0x10   : > { %s724_s8 = sshll.u32 %s1018_s6, 3  ;;  %s1027_s11 = scalar_lea.hbm %s1147_s0, %s725_s7 }
  0x11   : > { %s252_s12 = scalar_lea.vmem [#allocation2], %s724_s8  ;;  %p1033_p9 = pnand %p763_p8, %p1002_p3 }
  0x12   : > { %s260_s13 = sshll.u32 %s252_s12, 4  ;;  %s249_s15 = scalar_lea.sflag [#allocation3], %s1018_s6  ;;  %s1037_s13 = int_to_ptr.vmem [resolvable:$true] %s260_s13 }
  0x13   : > { %s815_s16 = scalar_lea.hbm %s1027_s11, 128  ;;  %p817_p13 = pneg %p1033_p9 }
  0x14   : > { %p816_p12 = scmp.ne.s32.totalorder %s1027_s11, %s815_s16  ;;  %s820_s24 = scalar_lea.hbm %s1147_s0, 256 }
  0x15   : > { %p821_p2 = scmp.lt.u32.totalorder %s1027_s11, %s1147_s0  ;;  %p822_p3 = scmp.lt.u32.totalorder %s820_s24, %s815_s16 }
  0x16   : > { %p818_p0 = pnand %p817_p13, %p816_p12  ;;  %p824_p5 = scmp.lt.u32.totalorder %s815_s16, %s1027_s11 }
  0x17   : > { %p823_p4 = por %p822_p3, %p821_p2 }
  0x18   : > { %p819_p1 = pneg %p818_p0 }
  0x19   : > { %p825_p6 = por %p824_p5, %p823_p4 }
  0x1b   : > { %p826_p8 = pnand %p825_p6, %p819_p1 }
  0x1d   : > { %829 = shalt.err (!%p826_p8)
}
  0x1e   : > { %s830_s28 = scalar_lea.vmem %s1037_s13, 128  ;;  %s931_s9 = smov [#allocation2]  }
  0x1f   : > { %p831_p12 = scmp.ne.s32.totalorder %s1037_s13, %s830_s28  ;;  %s835_s10 = sshll.u32 %s931_s9, 4  ;;  %s836_s10 = int_to_ptr.vmem [resolvable:$false] %s835_s10 }
  0x20   : > { %s837_s12 = scalar_lea.vmem %s836_s10, 256  ;;  %p838_p11 = scmp.lt.s32.totalorder %s1037_s13, %s836_s10 }
  0x21   : > { %p833_p0 = pnand %p831_p12, %p817_p13  ;;  %p839_p2 = scmp.lt.s32.totalorder %s837_s12, %s830_s28 }
  0x23   : > { %p834_p10 = pneg %p833_p0  ;;  %p840_p3 = por %p839_p2, %p838_p11 }
  0x25   : > { %p841_p4 = pnand %p840_p3, %p834_p10 }
  0x27   : > { %844 = shalt.err (!%p841_p4)
}
  0x28   : > { %759 = dma.hbm_to_vmem [thread:$0]  (!%p1033_p9), %s1027_s11, 128, %s1037_s13, %s249_s15  }
  0x29   : > { %p1157_p1 = scmp.lt.s32.totalorder %s929_s23, 3  ;;  %p1158_p5 = scmp.ge.s32.totalorder %s929_s23, 1 }
  0x2a   : > { %s1080_s24 = scalar_lea.hbm %s1148_s1, %s725_s7  ;;  %s271_s26 = scalar_lea.vmem [#allocation4], %s724_s8 }
  0x2b   : > { %p1071_p6 = pnand %p1158_p5, %p1157_p1  ;;  %s282_s27 = sshll.u32 %s271_s26, 4  ;;  %s283_s27 = int_to_ptr.vmem [resolvable:$true] %s282_s27 }
  0x2c   : > { %s268_s11 = scalar_lea.sflag [#allocation5], %s1018_s6  ;;  %s845_s13 = scalar_lea.hbm %s1080_s24, 128 }
  0x2d   : > { %s1159_s16 = scalar_select %p1071_p6, 1, 0 }
  0x2e   : > { %p846_p10 = scmp.ne.s32.totalorder %s1080_s24, %s845_s13  ;;  %s850_s7 = scalar_lea.hbm %s1148_s1, 256 }
  0x2f   : > { %p851_p12 = scmp.lt.u32.totalorder %s1080_s24, %s1148_s1  ;;  %p852_p0 = scmp.lt.u32.totalorder %s850_s7, %s845_s13 }
  0x30   : > { %p848_p11 = pnand %p846_p10, %p817_p13  ;;  %p854_p3 = scmp.lt.u32.totalorder %s845_s13, %s1080_s24 }
  0x31   : > { %p853_p2 = por %p852_p0, %p851_p12 }
  0x32   : > { %p849_p8 = pneg %p848_p11 }
  0x33   : > { %p855_p4 = por %p854_p3, %p853_p2 }
  0x35   : > { %p856_p1 = pnand %p855_p4, %p849_p8 }
  0x37   : > { %859 = shalt.err (!%p856_p1)
}
  0x38   : > { %s860_s6 = scalar_lea.vmem %s283_s27, 128  ;;  %s932_s8 = smov [#allocation4]  }
  0x39   : > { %p861_p5 = scmp.ne.s32.totalorder %s283_s27, %s860_s6  ;;  %s865_s12 = sshll.u32 %s932_s8, 4  ;;  %s866_s12 = int_to_ptr.vmem [resolvable:$false] %s865_s12 }
  0x3a   : > { %s867_s17 = scalar_lea.vmem %s866_s12, 256  ;;  %p868_p7 = scmp.lt.s32.totalorder %s283_s27, %s866_s12 }
  0x3b   : > { %p863_p10 = pnand %p861_p5, %p817_p13  ;;  %p869_p6 = scmp.lt.s32.totalorder %s867_s17, %s860_s6 }
  0x3d   : > { %p864_p11 = pneg %p863_p10  ;;  %p870_p0 = por %p869_p6, %p868_p7 }
  0x3f   : > { %p871_p12 = pnand %p870_p0, %p864_p11 }
  0x41   : > { %874 = shalt.err (!%p871_p12)
}
  0x42   : > { %762 = dma.hbm_to_vmem [thread:$0]  (!%p1033_p9), %s1080_s24, 128, %s283_s27, %s268_s11  }
  0x43   : > { %p1160_p8 = scmp.ne.s32.totalorder %s1159_s16, 0 }
  0x44   : > { %s293_s18 = sand.u32 (!%p1160_p8), 1, %s913_s19   ;;  %p1161_p13 = scmp.ne.s32.totalorder (!%p1160_p8), %s1155_s29, 0 }
  0x45   : > { %291 = sbr.rel (%p1160_p8) target bundleno = 415 (0x19f), region = 40  ;;  %s729_s26 = sshll.u32 (!%p1160_p8), %s293_s18, 3 }
  0x46   : > { %s294_s13 = scalar_lea.sflag (!%p1160_p8), [#allocation3], %s293_s18  ;;  %s297_s15 = scalar_lea.vmem (!%p1160_p8), [#allocation2], %s729_s26 }
  0x4c   : > { %900 = dma.done.wait (%p1161_p13), %s294_s13, 128  }
  0x4d   : > { %902 = vsyncadd (%p1161_p13), %s294_s13, 4294967168  ;;  %s303_s28 = scalar_lea.sflag [#allocation5], %s293_s18 }
  0x4e   : > { %904 = dma.done.wait (%p1161_p13), %s303_s28, 128  }
  0x4f   : > { %906 = vsyncadd (%p1161_p13), %s303_s28, 4294967168  ;;  %v933_v0 = vmov 0.0   ;;  %vm934_vm0 = vmmov 0   ;;  %vm398_vm1 = vcmask 1043456   ;;  %vm472_vm2 = vcmask 64512   ;;  %v378_v1 = vld [vmem:[%s297_s15] sm:$0xff] }
  0x50   : > { %747 = vmatprep.subr.mxu1 %v933_v0  ;;  %742 = vmatprep.subr.mxu0 %v933_v0  ;;  %vm389_vm3 = vcmask 1040384   ;;  %v379_v2 = vld [vmem:[%s1149_s2] sm:$0xff]  ;;  %v387_v4 = vrot.slane %v378_v1, 7  ;;  %s935_s29 = smov 124   ;;  %vm395_vm4 = vcmask 31744   ;;  %p368_p7 = scmp.lt.s32.totalorder %s921_s21, 1 }
  0x51   : > { %749 = vmatprep.mubr.msk.f32.mxu1 %vm934_vm0, %v933_v0  ;;  %744 = vmatprep.mubr.msk.f32.mxu0 %vm934_vm0, %v933_v0  ;;  %v391_v3 = vld [vmem:[%s1150_s3] sm:$0xf] }
  0x52   : > { %748 = vmatpush3.msra.mxu1 %v379_v2  ;;  %743 = vmatpush3.msk.msra.mxu0 %vm398_vm1, %v391_v3  ;;  %v390_v5 = vsel %vm389_vm3, 0.0, %v387_v4  ;;  %s1170_s21 = smov (!%p368_p7, %s921_s21), 1  ;;  %v735_v10 = vld [vmem:[%s1151_s4] ss:$0 sm:$0xff] }
  0x53   : > { %750 = vmatmul.mubr.msk.f32.vlgmr.msra.gmra.mrb[0].mxu1 %vm472_vm2, %v378_v1  ;;  %393 = vrot.lane.b32.xlu0 %v390_v5, %s935_s29  ;;  %s731_s11 = sshll.u32 %s1170_s21, 3 }
  0x54   : > { %s377_s8 = scalar_lea.vmem %s1152_s5, %s731_s11 }
  0xc5   : > { %v394_v6 = vpop.permute.xlu0 %393 }
  0xc6   : > { %745 = vmatmul.mubr.msk.f32.vlgmr.msra.gmra.mrb[0].mxu0 %vm395_vm4, %v394_v6 }
 0x126   : > { %v541_v7 = vpop.f32.mrb[0].mxu1 }
 0x127   : > { %v751_v8 = vpop.f32.mrb[1].mxu1 }
 0x199   : > { %v468_v9 = vpop.f32.mrb[0].mxu0 }
 0x19a   : > { %v542_v11 = vadd.f32 %v541_v7, %v468_v9  ;;  %v746_v12 = vpop.f32.mrb[1].mxu0 }
 0x19c   : > { %v552_v13 = vadd.f32 %v735_v10, %v542_v11 }
 0x19e   : > { %553 = vst.msk [vmem:[%s377_s8] sm:$0xff] %vm395_vm4, %v552_v13 }
 0x19f PF: > { %s21_s23 = sadd.s32 1, %s929_s23   ;;  %s1162_s18 = smov %s913_s19 }
 0x1a0   : > { %p18_p9 = scmp.ge.s32.totalorder %s21_s23, 4   ;;  %s1163_s19 = smov %s917_s20 }
 0x1a1   : > { %s1164_s20 = smov %s1015_s30  ;;  %s1165_s21 = smov %s925_s22 }
 0x1a2   : > { %s1166_s22 = smov %s1168_s25  ;;  %20 = sbr.rel (!%p18_p9) target bundleno = 6 (0x6), region = 102 }
 0x1a9   :  { %585 = vsyncpa [#allocation3], 1 }
 0x1aa   :  { %587 = vsyncpa [#allocation3 + $0x1], 1 }
 0x1ab   :  { %588 = vsyncpa [#allocation5], 1 }
 0x1ac   :  { %590 = vsyncpa [#allocation5 + $0x1], 1 }

</bundles_post_ra>
